<compile_context>
chip_gen: v7x
topology: tpu7x:2x2x1
jax: 0.10.0
libtpu: 0.0.40
codegen_flags: <defaults>
</compile_context>

<pallas_src>
import functools
import math

import jax
import jax.numpy as jnp
from jax.experimental import pallas as pl
from jax.experimental.pallas import tpu as pltpu


def _pick_tile(n, cap, align):
    """Largest divisor of n that is <= cap and a multiple of `align` (None if none)."""
    for d in range(min(cap, n), 0, -1):
        if n % d == 0 and d % align == 0:
            return d
    return None


def _smallest_aligned_divisor(n, align):
    for d in range(align, n + 1, align):
        if n % d == 0:
            return d
    return n


def _head_kernel(hs_ref, pooler_ref, w1_ref, w2_ref, b_ref, labels_ref,
                 logits_ref, nll_ref, acc_ref, *, num_classes, inv_seq):
    l = pl.program_id(1)
    s = pl.program_id(2)
    last_l = pl.num_programs(1) - 1
    last_s = pl.num_programs(2) - 1

    @pl.when((l == 0) & (s == 0))
    def _init():
        acc_ref[...] = jnp.zeros_like(acc_ref)

    # Sequence reduction on the MXU: contract the streamed (bf16) tile against a
    # ones vector with f32 accumulation.  This removes the per-element
    # upcast+add VALU cost of a jnp.sum reduction (important on v7x where the
    # VALU would otherwise co-limit the HBM stream).  All 8 rows of `part` are
    # identical; row 0 is the per-batch-row sequence sum.
    tile = hs_ref[...]                                       # (TB, TS, HP)
    tb, ts, _ = tile.shape
    ones_b = jnp.ones((tb, 8, ts), dtype=tile.dtype)
    part = jnp.einsum("bns,bsh->bnh", ones_b, tile,
                      preferred_element_type=jnp.float32)    # (TB, 8, HP)
    acc_ref[...] += part[:, 0, :]

    @pl.when((l == last_l) & (s == last_s))
    def _finalize():
        token_hidden = acc_ref[...] * jnp.float32(inv_seq)   # mean over seq, (TB, HP)
        pooled = pooler_ref[...].astype(jnp.float32)         # (TB, H)
        # Linear over concat([token_hidden, pooled]) as two matmuls on the
        # split (lane-padded, bf16-resident) weight halves — avoids an
        # in-kernel lane concatenate.
        logits = (
            jnp.dot(token_hidden, w1_ref[...].astype(jnp.float32),
                    preferred_element_type=jnp.float32)
            + jnp.dot(pooled, w2_ref[...].astype(jnp.float32),
                      preferred_element_type=jnp.float32)
            + b_ref[...]
        )                                                    # (TB, CP) lane-dense
        logits_ref[...] = logits

        # Fused cross-entropy: per-example negative log-likelihood.  Padded
        # lanes are masked; out-of-range / ignore_index labels pick nothing and
        # are excluded from the mean in the wrapper.
        col = jax.lax.broadcasted_iota(jnp.int32, logits.shape, 1)
        valid = col < num_classes
        masked = jnp.where(valid, logits, jnp.float32(-1e30))
        m = jnp.max(masked, axis=-1, keepdims=True)
        lse = jnp.log(jnp.sum(jnp.exp(masked - m), axis=-1, keepdims=True)) + m
        picked = jnp.sum(jnp.where(col == labels_ref[...], logits, 0.0),
                         axis=-1, keepdims=True)
        nll_ref[...] = lse - picked                          # (TB, 1)


def sequence_classifier_head(hidden_states, pooler_output, w, b, labels=None,
                             *, batch_tile=64, ignore_index=-100):
    """hidden_states: (L,B,S,H) native dtype (e.g. bf16); pooler_output: (B,H);
    w: (C, 2H) torch-layout Linear weight; b: (C,); labels: optional (B,) int."""
    L, B, S, H = hidden_states.shape
    C = b.shape[0]
    CP = max(128, ((C + 127) // 128) * 128)          # lane-dense padded class dim

    # Lane packing for small hidden sizes: (L,B,S,H) -> (L,B,S/k, k*H) so the lane
    # dim is a multiple of 128 (free, contiguous reshape).  The k seq-groups'
    # partial sums are folded for free by tiling w1 k times along its rows.
    k = 1
    if H < 128 and H % 128 != 0:
        k_cand = 128 // math.gcd(H, 128)
        if S % k_cand == 0:
            k = k_cand
    HP, Sp = H * k, S // k
    hs = hidden_states.reshape(L, B, Sp, HP) if k > 1 else hidden_states
    itemsize = jnp.dtype(hs.dtype).itemsize

    # Generation-aware VMEM limit (v5e/v6e: 128 MiB physical -> ~96 MiB limit;
    # v7x: 64 MiB/TC -> ~48 MiB).  Conservative fallback if the query fails.
    try:
        vmem_cap = int(pltpu.get_tpu_info().vmem_capacity_bytes)
    except Exception:
        vmem_cap = 64 * 2**20
    vmem_limit = max(min(vmem_cap * 3 // 4, 100 * 2**20), 32 * 2**20)

    # Batch tile: as large as possible (sublane-aligned; full-B fallback is always
    # legal), preferring >= 2 batch blocks so the leading "parallel" grid axis can
    # feed both v7x TensorCores.
    TB = _pick_tile(B, min(batch_tile, max(B // 2, 1)), 8)
    if TB is None:
        TB = _pick_tile(B, batch_tile, 8)
    if TB is None:
        TB = B

    # Sequence tile: full sequence if it fits the per-buffer budget, else the
    # largest 8-aligned divisor that does — keeps per-step DMAs multi-MiB so the
    # ~0.35 us/step grid overhead is negligible, while fitting the VMEM budget.
    fixed_bytes = (
        2 * 2 * (HP * CP + H * CP)                   # bf16 w1/w2, double-buffered
        + 2 * TB * H * itemsize                      # pooler double-buffer
        + 2 * TB * (CP + 128) * 4                    # logits / nll output blocks
        + 2 * TB * 128 * 4                           # labels block (lane-padded)
        + TB * HP * 4 + 2 * CP * 4                   # f32 accumulator + bias
    )
    hs_buf_budget = max((vmem_limit - fixed_bytes) // 2 - (4 << 20), 1 << 20)
    hs_buf_budget = min(hs_buf_budget, 16 << 20)
    row_bytes = TB * HP * itemsize
    if Sp * row_bytes <= hs_buf_budget:
        TS = Sp
    else:
        TS = _pick_tile(Sp, max(hs_buf_budget // row_bytes, 1), 8)
        if TS is None:
            TS = _smallest_aligned_divisor(Sp, 8)
    nb, ns = B // TB, Sp // TS

    # Weight prep (tiny; in production done once at model-load time): split the
    # torch (C, 2H) weight into halves acting on token_hidden / pooler, transpose
    # to (H, C), tile the token half k times (packing fold), zero-pad lanes to CP
    # and store bf16 (halves resident weight VMEM).  Bias stays f32 (512 B).
    w1 = jnp.zeros((HP, CP), jnp.bfloat16).at[:, :C].set(
        jnp.tile(jnp.transpose(w[:, :H]), (k, 1)).astype(jnp.bfloat16))
    w2 = jnp.zeros((H, CP), jnp.bfloat16).at[:, :C].set(
        jnp.transpose(w[:, H:]).astype(jnp.bfloat16))
    bp = jnp.zeros((1, CP), jnp.float32).at[:, :C].set(
        b.astype(jnp.float32).reshape(1, C))

    if labels is None:
        labels2d = jnp.zeros((B, 1), jnp.int32)      # dummy; NLL output ignored
    else:
        labels2d = labels.reshape(B, 1).astype(jnp.int32)

    kernel = functools.partial(_head_kernel, num_classes=C, inv_seq=1.0 / S)

    logits_slab, nll = pl.pallas_call(
        kernel,
        out_shape=(
            jax.ShapeDtypeStruct((B, CP), jnp.float32),
            jax.ShapeDtypeStruct((B, 1), jnp.float32),
        ),
        grid_spec=pltpu.PrefetchScalarGridSpec(
            num_scalar_prefetch=0,
            grid=(nb, L, ns),
            in_specs=[
                # one layer slab per step, squeezed L dim
                pl.BlockSpec((None, TB, TS, HP), lambda bi, li, si: (li, bi, si, 0)),
                pl.BlockSpec((TB, H), lambda bi, li, si: (bi, 0)),
                pl.BlockSpec((HP, CP), lambda bi, li, si: (0, 0)),
                pl.BlockSpec((H, CP), lambda bi, li, si: (0, 0)),
                pl.BlockSpec((1, CP), lambda bi, li, si: (0, 0)),
                pl.BlockSpec((TB, 1), lambda bi, li, si: (bi, 0)),
            ],
            out_specs=[
                pl.BlockSpec((TB, CP), lambda bi, li, si: (bi, 0)),
                pl.BlockSpec((TB, 1), lambda bi, li, si: (bi, 0)),
            ],
            scratch_shapes=[pltpu.VMEM((TB, HP), jnp.float32)],
        ),
        compiler_params=pltpu.CompilerParams(
            dimension_semantics=("parallel", "arbitrary", "arbitrary"),
            vmem_limit_bytes=int(vmem_limit)),
    )(hs, pooler_output, w1, w2, bp, labels2d)

    outputs = [logits_slab[:, :C]]
    if labels is not None:
        # torch CrossEntropyLoss(reduction='mean', ignore_index=-100): mean of
        # per-example NLL over valid labels only.
        lab = labels.reshape(-1).astype(jnp.int32)
        valid = ((lab != ignore_index) & (lab >= 0) & (lab < C)).astype(jnp.float32)
        denom = jnp.maximum(jnp.sum(valid), 1.0)
        outputs.append(jnp.sum(nll[:, 0] * valid) / denom)
    return outputs


if __name__ == "__main__":
    # Small shapes consistent with the forward: batch=2, seq=8, hidden=32,
    # n_layers=4, num_classes=2.
    B, S, H, L, C = 2, 8, 32, 4, 2
    key = jax.random.PRNGKey(0)
    k_hs, k_pool, k_w, k_b, k_lab = jax.random.split(key, 5)

    # TODO(synk): the external transformer_model forward (and the data-dependent
    # max_length truncation of input_ids/attention_mask) has no Pallas equivalent
    # here; its outputs are synthesized deterministically instead.
    hidden_states = jax.random.normal(k_hs, (L, B, S, H), jnp.float32).astype(
        jnp.bfloat16)                                                      # hidden[2][-L:]
    pooler_output = jnp.tanh(
        jax.random.normal(k_pool, (B, H), jnp.float32)).astype(jnp.bfloat16)  # hidden[1]

    # Linear(2H -> C), deterministic init (torch weight layout (C, 2H), bias (C,)).
    w = jax.random.normal(k_w, (C, 2 * H), jnp.float32) * 0.02
    b = jax.random.normal(k_b, (C,), jnp.float32) * 0.02
    labels = jax.random.randint(k_lab, (B,), 0, C)

    logits, loss = sequence_classifier_head(hidden_states, pooler_output, w, b, labels)
    (logits_only,) = sequence_classifier_head(hidden_states, pooler_output, w, b)
    labels_ign = labels.at[0].set(-100)                 # exercise ignore_index
    _, loss_ign = sequence_classifier_head(hidden_states, pooler_output, w, b, labels_ign)
    jax.block_until_ready((logits, loss, logits_only, loss_ign))

    # Plain-JAX reference (f32 math on the same bf16 activations and the same
    # bf16-stored classifier weights the kernel uses).
    hs32 = hidden_states.astype(jnp.float32)
    pool32 = pooler_output.astype(jnp.float32)
    w_used = w.astype(jnp.bfloat16).astype(jnp.float32)
    token_hidden = jnp.mean(jnp.sum(hs32, axis=0), axis=1)
    cat = jnp.concatenate([token_hidden, pool32], axis=1)
    ref_logits = cat @ w_used.T + b
    ref_lse = jax.nn.logsumexp(ref_logits, axis=-1)
    ref_nll = ref_lse - ref_logits[jnp.arange(B), labels]
    ref_loss = jnp.mean(ref_nll)
    ref_loss_ign = ref_nll[1]                           # example 0 ignored

    assert jnp.allclose(logits, ref_logits, atol=1e-4), (logits, ref_logits)
    assert jnp.allclose(logits_only, ref_logits, atol=1e-4), (logits_only, ref_logits)
    assert jnp.allclose(loss, ref_loss, atol=1e-4), (loss, ref_loss)
    assert jnp.allclose(loss_ign, ref_loss_ign, atol=1e-4), (loss_ign, ref_loss_ign)

    print("KERNEL_OK")
</pallas_src>

<mosaic_0001>
module attributes {stable_mosaic.version = 11 : i64} {
  func.func @_head_kernel(%arg0: i32, %arg1: i32, %arg2: i32, %arg3: memref<1x2x2x128xbf16, #tpu.memory_space<vmem>>, %arg4: memref<2x32xbf16, #tpu.memory_space<vmem>>, %arg5: memref<128x128xbf16, #tpu.memory_space<vmem>>, %arg6: memref<32x128xbf16, #tpu.memory_space<vmem>>, %arg7: memref<1x128xf32, #tpu.memory_space<vmem>>, %arg8: memref<2x1xi32, #tpu.memory_space<vmem>>, %arg9: memref<2x128xf32, #tpu.memory_space<vmem>>, %arg10: memref<2x1xf32, #tpu.memory_space<vmem>>, %arg11: memref<2x128xf32, #tpu.memory_space<vmem>>) attributes {dimension_semantics = [#tpu.dimension_semantics<parallel>, #tpu.dimension_semantics<arbitrary>, #tpu.dimension_semantics<arbitrary>], iteration_bounds = array<i64: 1, 4, 1>, scalar_prefetch = 0 : i64, scratch_operands = 1 : i64, tpu.core_type = #tpu.core_type<tc>, window_params = [{transform_indices = @transform_0, window_bounds = array<i64: 1, 2, 2, 128>}, {transform_indices = @transform_1, window_bounds = array<i64: 2, 32>}, {pipeline_mode = #tpu.pipeline_mode<synchronous>, transform_indices = @transform_2, window_bounds = array<i64: 128, 128>}, {pipeline_mode = #tpu.pipeline_mode<synchronous>, transform_indices = @transform_3, window_bounds = array<i64: 32, 128>}, {pipeline_mode = #tpu.pipeline_mode<synchronous>, transform_indices = @transform_4, window_bounds = array<i64: 1, 128>}, {transform_indices = @transform_5, window_bounds = array<i64: 2, 1>}, {transform_indices = @transform_6, window_bounds = array<i64: 2, 128>}, {transform_indices = @transform_7, window_bounds = array<i64: 2, 1>}]} {
    %c0_i32 = arith.constant 0 : i32
    %0 = arith.cmpi eq, %arg1, %c0_i32 : i32
    %c0_i32_0 = arith.constant 0 : i32
    %1 = arith.cmpi eq, %arg2, %c0_i32_0 : i32
    %2 = arith.andi %0, %1 : i1
    %3 = arith.extui %2 : i1 to i32
    %c0_i32_1 = arith.constant 0 : i32
    %4 = arith.cmpi ne, %3, %c0_i32_1 : i32
    scf.if %4 {
      %cst_12 = arith.constant 0.000000e+00 : f32
      %19 = vector.broadcast %cst_12 : f32 to vector<2x128xf32>
      %c0_13 = arith.constant 0 : index
      %c0_14 = arith.constant 0 : index
      %20 = vector.load %arg11[%c0_13, %c0_14] : memref<2x128xf32, #tpu.memory_space<vmem>>, vector<2x128xf32>
      tpu.vector_store %arg11[%c0_13, %c0_14], %19 {strides = array<i32>} : memref<2x128xf32, #tpu.memory_space<vmem>>, vector<2x128xf32>,
    } else {
    }
    %c0 = arith.constant 0 : index
    %c0_2 = arith.constant 0 : index
    %c0_3 = arith.constant 0 : index
    %c0_4 = arith.constant 0 : index
    %5 = vector.load %arg3[%c0, %c0_2, %c0_3, %c0_4] : memref<1x2x2x128xbf16, #tpu.memory_space<vmem>>, vector<1x2x2x128xbf16>
    %6 = vector.shape_cast %5 : vector<1x2x2x128xbf16> to vector<2x2x128xbf16>
    %cst = arith.constant 1.000000e+00 : bf16
    %7 = vector.broadcast %cst : bf16 to vector<2x8x2xbf16>
    "tpu.trace_start"() <{level = 10 : i32, message = "bns,bsh->bnh"}> : () -> ()
    %cst_5 = arith.constant dense<0.000000e+00> : vector<2x8x128xf32>
    %8 = tpu.matmul %7, %6, %cst_5 {dimension_numbers = #tpu.dot_dimension_numbers<[2], [1], [1], [2], [0, 0, 0, 1, 1, 2], [0], [0]>} : vector<2x8x2xbf16>, vector<2x2x128xbf16>, vector<2x8x128xf32> -> vector<2x8x128xf32>
    "tpu.trace_stop"() : () -> ()
    %c0_6 = arith.constant 0 : index
    %c0_7 = arith.constant 0 : index
    %9 = vector.load %arg11[%c0_6, %c0_7] : memref<2x128xf32, #tpu.memory_space<vmem>>, vector<2x128xf32>
    %10 = vector.extract_strided_slice %8 {offsets = [0, 0, 0], sizes = [2, 1, 128], strides = [1, 1, 1]} : vector<2x8x128xf32> to vector<2x1x128xf32>
    %11 = vector.shape_cast %10 : vector<2x1x128xf32> to vector<2x128xf32>
    %12 = arith.addf %9, %11 : vector<2x128xf32>
    %c0_8 = arith.constant 0 : index
    %c0_9 = arith.constant 0 : index
    %13 = vector.load %arg11[%c0_8, %c0_9] : memref<2x128xf32, #tpu.memory_space<vmem>>, vector<2x128xf32>
    tpu.vector_store %arg11[%c0_8, %c0_9], %12 {strides = array<i32>} : memref<2x128xf32, #tpu.memory_space<vmem>>, vector<2x128xf32>,
    %c3_i32 = arith.constant 3 : i32
    %14 = arith.cmpi eq, %arg1, %c3_i32 : i32
    %c0_i32_10 = arith.constant 0 : i32
    %15 = arith.cmpi eq, %arg2, %c0_i32_10 : i32
    %16 = arith.andi %14, %15 : i1
    %17 = arith.extui %16 : i1 to i32
    %c0_i32_11 = arith.constant 0 : i32
    %18 = arith.cmpi ne, %17, %c0_i32_11 : i32
    scf.if %18 {
      %c0_12 = arith.constant 0 : index
      %c0_13 = arith.constant 0 : index
      %19 = vector.load %arg11[%c0_12, %c0_13] : memref<2x128xf32, #tpu.memory_space<vmem>>, vector<2x128xf32>
      %cst_14 = arith.constant 1.250000e-01 : f32
      %20 = vector.broadcast %cst_14 : f32 to vector<2x128xf32>
      %21 = arith.mulf %19, %20 : vector<2x128xf32>
      %c0_15 = arith.constant 0 : index
      %c0_16 = arith.constant 0 : index
      %22 = vector.load %arg4[%c0_15, %c0_16] : memref<2x32xbf16, #tpu.memory_space<vmem>>, vector<2x32xbf16>
      %23 = arith.extf %22 : vector<2x32xbf16> to vector<2x32xf32>
      %c0_17 = arith.constant 0 : index
      %c0_18 = arith.constant 0 : index
      %24 = vector.load %arg5[%c0_17, %c0_18] : memref<128x128xbf16, #tpu.memory_space<vmem>>, vector<128x128xbf16>
      %25 = arith.extf %24 : vector<128x128xbf16> to vector<128x128xf32>
      %cst_19 = arith.constant dense<0.000000e+00> : vector<2x128xf32>
      %26 = tpu.matmul %21, %25, %cst_19 {dimension_numbers = #tpu.dot_dimension_numbers<[1], [0], [0], [1], [0, 0, 1, 1], [], []>} : vector<2x128xf32>, vector<128x128xf32>, vector<2x128xf32> -> vector<2x128xf32>
      %c0_20 = arith.constant 0 : index
      %c0_21 = arith.constant 0 : index
      %27 = vector.load %arg6[%c0_20, %c0_21] : memref<32x128xbf16, #tpu.memory_space<vmem>>, vector<32x128xbf16>
      %28 = arith.extf %27 : vector<32x128xbf16> to vector<32x128xf32>
      %cst_22 = arith.constant dense<0.000000e+00> : vector<2x128xf32>
      %29 = tpu.matmul %23, %28, %cst_22 {dimension_numbers = #tpu.dot_dimension_numbers<[1], [0], [0], [1], [0, 0, 1, 1], [], []>} : vector<2x32xf32>, vector<32x128xf32>, vector<2x128xf32> -> vector<2x128xf32>
      %30 = arith.addf %26, %29 : vector<2x128xf32>
      %c0_23 = arith.constant 0 : index
      %c0_24 = arith.constant 0 : index
      %31 = vector.load %arg7[%c0_23, %c0_24] : memref<1x128xf32, #tpu.memory_space<vmem>>, vector<1x128xf32>
      %32 = vector.broadcast %31 : vector<1x128xf32> to vector<2x128xf32>
      %33 = arith.addf %30, %32 : vector<2x128xf32>
      %c0_25 = arith.constant 0 : index
      %c0_26 = arith.constant 0 : index
      %34 = vector.load %arg9[%c0_25, %c0_26] : memref<2x128xf32, #tpu.memory_space<vmem>>, vector<2x128xf32>
      tpu.vector_store %arg9[%c0_25, %c0_26], %33 {strides = array<i32>} : memref<2x128xf32, #tpu.memory_space<vmem>>, vector<2x128xf32>,
      %35 = tpu.iota {dimensions = array<i32: 1>} : vector<2x128xi32>
      %c2_i32 = arith.constant 2 : i32
      %36 = vector.broadcast %c2_i32 : i32 to vector<2x128xi32>
      %37 = arith.cmpi slt, %35, %36 : vector<2x128xi32>
      %cst_27 = arith.constant -1.000000e+30 : f32
      %38 = vector.broadcast %cst_27 : f32 to vector<2x128xf32>
      %39 = arith.select %37, %33, %38 : vector<2x128xi1>, vector<2x128xf32>
      %cst_28 = arith.constant dense<0xFF800000> : vector<2xf32>
      %40 = vector.multi_reduction <maximumf>, %39, %cst_28 [1] : vector<2x128xf32> to vector<2xf32>
      %41 = vector.shape_cast %40 : vector<2xf32> to vector<2x1xf32>
      %42 = vector.broadcast %41 : vector<2x1xf32> to vector<2x128xf32>
      %43 = arith.subf %39, %42 : vector<2x128xf32>
      %44 = math.exp %43 : vector<2x128xf32>
      %cst_29 = arith.constant dense<0.000000e+00> : vector<2xf32>
      %45 = vector.multi_reduction <add>, %44, %cst_29 [1] : vector<2x128xf32> to vector<2xf32>
      %46 = vector.shape_cast %45 : vector<2xf32> to vector<2x1xf32>
      %47 = math.log %46 : vector<2x1xf32>
      %48 = arith.addf %47, %41 : vector<2x1xf32>
      %c0_30 = arith.constant 0 : index
      %c0_31 = arith.constant 0 : index
      %49 = vector.load %arg8[%c0_30, %c0_31] : memref<2x1xi32, #tpu.memory_space<vmem>>, vector<2x1xi32>
      %50 = vector.broadcast %49 : vector<2x1xi32> to vector<2x128xi32>
      %51 = arith.cmpi eq, %35, %50 : vector<2x128xi32>
      %cst_32 = arith.constant 0.000000e+00 : f32
      %52 = vector.broadcast %cst_32 : f32 to vector<2x128xf32>
      %53 = arith.select %51, %33, %52 : vector<2x128xi1>, vector<2x128xf32>
      %cst_33 = arith.constant dense<0.000000e+00> : vector<2xf32>
      %54 = vector.multi_reduction <add>, %53, %cst_33 [1] : vector<2x128xf32> to vector<2xf32>
      %55 = vector.shape_cast %54 : vector<2xf32> to vector<2x1xf32>
      %56 = arith.subf %48, %55 : vector<2x1xf32>
      %c0_34 = arith.constant 0 : index
      %c0_35 = arith.constant 0 : index
      %57 = vector.load %arg10[%c0_34, %c0_35] : memref<2x1xf32, #tpu.memory_space<vmem>>, vector<2x1xf32>
      tpu.vector_store %arg10[%c0_34, %c0_35], %56 {strides = array<i32>} : memref<2x1xf32, #tpu.memory_space<vmem>>, vector<2x1xf32>,
    } else {
    }
    return
  }
  func.func @transform_0(%arg0: i32, %arg1: i32, %arg2: i32) -> (i32, i32, i32, i32) {
    %c0_i32 = arith.constant 0 : i32
    %c0_i32_0 = arith.constant 0 : i32
    return %arg1, %arg0, %arg2, %c0_i32 : i32, i32, i32, i32
  }
  func.func @transform_1(%arg0: i32, %arg1: i32, %arg2: i32) -> (i32, i32) {
    %c0_i32 = arith.constant 0 : i32
    %c0_i32_0 = arith.constant 0 : i32
    return %arg0, %c0_i32 : i32, i32
  }
  func.func @transform_2(%arg0: i32, %arg1: i32, %arg2: i32) -> (i32, i32) {
    %c0_i32 = arith.constant 0 : i32
    %c0_i32_0 = arith.constant 0 : i32
    %c0_i32_1 = arith.constant 0 : i32
    return %c0_i32, %c0_i32_0 : i32, i32
  }
  func.func @transform_3(%arg0: i32, %arg1: i32, %arg2: i32) -> (i32, i32) {
    %c0_i32 = arith.constant 0 : i32
    %c0_i32_0 = arith.constant 0 : i32
    %c0_i32_1 = arith.constant 0 : i32
    return %c0_i32, %c0_i32_0 : i32, i32
  }
  func.func @transform_4(%arg0: i32, %arg1: i32, %arg2: i32) -> (i32, i32) {
    %c0_i32 = arith.constant 0 : i32
    %c0_i32_0 = arith.constant 0 : i32
    %c0_i32_1 = arith.constant 0 : i32
    return %c0_i32, %c0_i32_0 : i32, i32
  }
  func.func @transform_5(%arg0: i32, %arg1: i32, %arg2: i32) -> (i32, i32) {
    %c0_i32 = arith.constant 0 : i32
    %c0_i32_0 = arith.constant 0 : i32
    return %arg0, %c0_i32 : i32, i32
  }
  func.func @transform_6(%arg0: i32, %arg1: i32, %arg2: i32) -> (i32, i32) {
    %c0_i32 = arith.constant 0 : i32
    %c0_i32_0 = arith.constant 0 : i32
    return %arg0, %c0_i32 : i32, i32
  }
  func.func @transform_7(%arg0: i32, %arg1: i32, %arg2: i32) -> (i32, i32) {
    %c0_i32 = arith.constant 0 : i32
    %c0_i32_0 = arith.constant 0 : i32
    return %arg0, %c0_i32 : i32, i32
  }
}

</mosaic_0001>

<bundles_post_ra>
// kernel: tpu_custom_call.1
= control target key start
LH: loop header
LB: loop body
LE: loop exit
PB: predicated region body
PF: predicated region fallthrough
CT: control target
= control target key end

     0   :  { %13 = vsyncpa [#allocation4], 0  ;;  %s1636_s0 = inlined_call_operand.hbm [shape: bf16[4,2,2,128], index: 0, kind: input, shape index: {}]   ;;  %s1637_s1 = inlined_call_operand.vmem [shape: bf16[2,32], index: 1, kind: input, shape index: {}]   ;;  %s1638_s2 = inlined_call_operand.hbm [shape: bf16[128,128], index: 2, kind: input, shape index: {}]   ;;  %s1639_s3 = inlined_call_operand.hbm [shape: bf16[32,128], index: 3, kind: input, shape index: {}]   ;;  %s1640_s4 = inlined_call_operand.vmem [shape: f32[1,128], index: 4, kind: input, shape index: {}]   ;;  %s1641_s5 = inlined_call_operand.vmem [shape: s32[2,1], index: 5, kind: input, shape index: {}]   ;;  %s1642_s6 = inlined_call_operand.hbm [shape: f32[2,128], index: 6, kind: output, shape index: {0}]   ;;  %s1643_s7 = inlined_call_operand.vmem [shape: f32[2,1], index: 7, kind: output, shape index: {1}]  }
   0x1   :  { %15 = vsyncpa [#allocation4 + $0x1], 0 }
   0x2   :  { %16 = vsyncpa [#allocation7], 0 }
   0x3   :  { %17 = vsyncpa [#allocation5], 0  ;;  %s1399_s24 = smov 0   ;;  %s1401_s25 = smov 0  }
   0x4   :  { %s1403_s26 = smov 0   ;;  %s1405_s27 = smov 0  }
   0x5   :  { %s1407_s28 = smov 0   ;;  %s1409_s29 = smov 0  }
   0x6 LB: > { %s881_s30 = sadd.s32 4294967295, %s1341_s29   ;;  %p66_p0 = scmp.ne.s32.totalorder %s1325_s25, %s1321_s24  ;;  %s1341_s29 = sphi %s1409_s29, %s23_s29   ;;  %s1337_s28 = sphi %s1407_s28, %s1661_s28   ;;  %s1333_s27 = sphi %s1405_s27, %s1660_s27   ;;  %s1329_s26 = sphi %s1403_s26, %s1659_s26   ;;  %s1325_s25 = sphi %s1401_s25, %s1658_s25   ;;  %s1321_s24 = sphi %s1399_s24, %s1657_s24  }
   0x7   : > { %p1431_p1 = scmp.eq.s32.totalorder %s881_s30, 0  ;;  %p882_p2 = scmp.ge.s32.totalorder %s1341_s29, 1 }
   0x8   : > { %p244_p3 = scmp.lt.s32.totalorder %s1341_s29, 5  ;;  %s1343_s11 = smov [#allocation6]  }
   0x9   : > { %s1648_s8 = scalar_select %p1431_p1, 1, 0 }
   0xa   : > { %p1439_p4 = por %p1431_p1, %p66_p0  ;;  %p1443_p5 = pnand %p882_p2, %p244_p3 }
   0xb   : > { %s262_s12 = sshll.u32 %s1343_s11, 4  ;;  %s1344_s14 = smov [#allocation8]   ;;  %s263_s12 = int_to_ptr.vmem [resolvable:$true] %s262_s12 }
   0xc   : > { %s1649_s9 = scalar_select %p1439_p4, 1, 0 }
   0xd   : > { %s1650_s10 = scalar_select %p1443_p5, 1, 0 }
   0xe   : > { %p1085_p6 = pneg %p1443_p5  ;;  %s275_s15 = sshll.u32 %s1344_s14, 4  ;;  %s1455_s15 = int_to_ptr.vmem [resolvable:$true] %s275_s15 }
   0xf   : > { %s1171_s18 = scalar_lea.hbm %s1638_s2, 1024 }
  0x10   : > { %p1451_p7 = pnand %p1085_p6, %p1431_p1  ;;  %p1172_p8 = scmp.ne.s32.totalorder %s1638_s2, %s1171_s18 }
  0x11   : > { %p1178_p12 = scmp.lt.u32.totalorder %s1171_s18, %s1638_s2 }
  0x12   : > { %p1173_p9 = pneg %p1451_p7 }
  0x14   : > { %p1174_p10 = pnand %p1173_p9, %p1172_p8 }
  0x16   : > { %p1175_p11 = pneg %p1174_p10 }
  0x18   : > { %p1180_p13 = pnand %p1178_p12, %p1175_p11 }
  0x1a   : > { %1183 = shalt.err (!%p1180_p13)
}
  0x1b   : > { %s1184_s23 = scalar_lea.vmem %s263_s12, 1024  ;;  %p1192_p6 = scmp.lt.s32.totalorder %s263_s12, %s263_s12 }
  0x1c   : > { %p1185_p0 = scmp.ne.s32.totalorder %s263_s12, %s1184_s23  ;;  %p1193_p1 = scmp.lt.s32.totalorder %s1184_s23, %s1184_s23 }
  0x1e   : > { %p1187_p2 = pnand %p1185_p0, %p1173_p9  ;;  %p1194_p4 = por %p1193_p1, %p1192_p6 }
  0x20   : > { %p1188_p3 = pneg %p1187_p2 }
  0x22   : > { %p1195_p5 = pnand %p1194_p4, %p1188_p3 }
  0x24   : > { %1198 = shalt.err (!%p1195_p5)
}
  0x25   : > { %s1345_s24 = smov 64   ;;  %s1346_s11 = smov 4  }
  0x26   : > { %1088 = dma.hbm_to_vmem [thread:$0]  (!%p1451_p7), %s1638_s2, 1024, %s263_s12, [#allocation7], %s1345_s24, %s1345_s24, %s1346_s11  }
  0x27   : > { %s1199_s19 = scalar_lea.hbm %s1639_s3, 256 }
  0x28   : > { %p1200_p8 = scmp.ne.s32.totalorder %s1639_s3, %s1199_s19  ;;  %p1206_p5 = scmp.lt.u32.totalorder %s1199_s19, %s1639_s3 }
  0x2a   : > { %p1202_p1 = pnand %p1200_p8, %p1173_p9 }
  0x2c   : > { %p1203_p4 = pneg %p1202_p1 }
  0x2e   : > { %p1208_p10 = pnand %p1206_p5, %p1203_p4 }
  0x30   : > { %1211 = shalt.err (!%p1208_p10)
}
  0x31   : > { %s1212_s12 = scalar_lea.vmem %s1455_s15, 256  ;;  %p1220_p0 = scmp.lt.s32.totalorder %s1455_s15, %s1455_s15 }
  0x32   : > { %p1213_p11 = scmp.ne.s32.totalorder %s1455_s15, %s1212_s12  ;;  %p1221_p2 = scmp.lt.s32.totalorder %s1212_s12, %s1212_s12 }
  0x34   : > { %p1215_p12 = pnand %p1213_p11, %p1173_p9  ;;  %p1222_p3 = por %p1221_p2, %p1220_p0 }
  0x36   : > { %p1216_p13 = pneg %p1215_p12 }
  0x38   : > { %p1223_p6 = pnand %p1222_p3, %p1216_p13 }
  0x3a   : > { %1226 = shalt.err (!%p1223_p6)
}
  0x3b   : > { %1091 = dma.hbm_to_vmem [thread:$0]  (!%p1451_p7), %s1639_s3, 256, %s1455_s15, [#allocation7], %s1345_s24, %s1345_s24, %s1346_s11  }
  0x3c   : > { %s38_s17 = sadd.s32 1, %s1337_s28  ;;  %s53_s18 = sadd.s32 1, %s1329_s26 }
  0x3d   : > { %p40_p9 = scmp.ge.s32.totalorder %s38_s17, 4  ;;  %p60_p8 = scmp.ne.s32.totalorder %s1329_s26, %s1325_s25 }
  0x3e   : > { %p61_p1 = scmp.eq.s32.totalorder %s1341_s29, 0  ;;  %p1098_p4 = scmp.lt.s32.totalorder %s1341_s29, 4 }
  0x3f   : > { %s1663_s17 = smov (%p40_p9, %s38_s17), 0  ;;  %s299_s13 = sand.u32 1, %s1329_s26  }
  0x40   : > { %p62_p5 = por %p61_p1, %p60_p8  ;;  %s46_s19 = ssub.s32 %s1337_s28, %s1663_s17 }
  0x41   : > { %p51_p10 = scmp.eq.s32.totalorder %s46_s19, 0  ;;  %s888_s20 = sshll.u32 %s299_s13, 1 }
  0x42   : > { %s906_s21 = sshll.u32 %s1337_s28, 5  ;;  %s303_s11 = scalar_lea.vmem [#allocation3], %s888_s20 }
  0x43   : > { %s1517_s22 = scalar_select %p51_p10, %s1329_s26, %s53_s18  }
  0x44   : > { %s1522_s24 = scalar_lea.hbm %s1636_s0, %s906_s21  ;;  %s313_s12 = sshll.u32 %s303_s11, 4  ;;  %s1524_s12 = int_to_ptr.vmem [resolvable:$true] %s313_s12 }
  0x45   : > { %p1528_p7 = pnand %p1098_p4, %p62_p5  ;;  %s1532_s16 = scalar_lea.sflag [#allocation4], %s299_s13 }
  0x46   : > { %s1227_s18 = scalar_lea.hbm %s1522_s24, 32  ;;  %s1232_s21 = scalar_lea.hbm %s1636_s0, 128 }
  0x47   : > { %p1228_p11 = scmp.ne.s32.totalorder %s1522_s24, %s1227_s18  ;;  %p1229_p12 = pneg %p1528_p7 }
  0x48   : > { %p1233_p2 = scmp.lt.u32.totalorder %s1522_s24, %s1636_s0  ;;  %p1234_p3 = scmp.lt.u32.totalorder %s1232_s21, %s1227_s18 }
  0x49   : > { %p1230_p13 = pnand %p1229_p12, %p1228_p11  ;;  %p1236_p9 = scmp.lt.u32.totalorder %s1227_s18, %s1522_s24 }
  0x4a   : > { %p1235_p6 = por %p1234_p3, %p1233_p2 }
  0x4b   : > { %p1231_p0 = pneg %p1230_p13 }
  0x4c   : > { %p1237_p8 = por %p1236_p9, %p1235_p6 }
  0x4e   : > { %p1238_p1 = pnand %p1237_p8, %p1231_p0 }
  0x50   : > { %1241 = shalt.err (!%p1238_p1)
}
  0x51   : > { %s1242_s13 = scalar_lea.vmem %s1524_s12, 32  ;;  %s1347_s11 = smov [#allocation3]  }
  0x52   : > { %p1243_p4 = scmp.ne.s32.totalorder %s1524_s12, %s1242_s13  ;;  %s1247_s19 = sshll.u32 %s1347_s11, 4  ;;  %s1248_s19 = int_to_ptr.vmem [resolvable:$false] %s1247_s19 }
  0x53   : > { %s1249_s20 = scalar_lea.vmem %s1248_s19, 64  ;;  %p1250_p11 = scmp.lt.s32.totalorder %s1524_s12, %s1248_s19 }
  0x54   : > { %p1245_p5 = pnand %p1243_p4, %p1229_p12  ;;  %p1251_p13 = scmp.lt.s32.totalorder %s1249_s20, %s1242_s13 }
  0x56   : > { %p1246_p10 = pneg %p1245_p5  ;;  %p1252_p2 = por %p1251_p13, %p1250_p11 }
  0x58   : > { %p1253_p3 = pnand %p1252_p2, %p1246_p10 }
  0x5a   : > { %1256 = shalt.err (!%p1253_p3)
}
  0x5b   : > { %s1348_s18 = smov 16   ;;  %s1349_s21 = smov 1  }
  0x5c   : > { %1095 = dma.hbm_to_vmem [thread:$0]  (!%p1528_p7), %s1522_s24, 32, %s1524_s12, %s1532_s16, %s1348_s18, %s1348_s18, %s1349_s21  }
  0x5d   : > { %p1653_p12 = scmp.ne.s32.totalorder %s1650_s10, 0 }
  0x5e   : > { %s327_s23 = sand.u32 (!%p1653_p12), 1, %s1325_s25   ;;  %p1654_p0 = scmp.ne.s32.totalorder (!%p1653_p12), %s1649_s9, 0 }
  0x5f   : > { %325 = sbr.rel (%p1653_p12) target bundleno = 908 (0x38c), region = 44  ;;  %s892_s15 = sshll.u32 (!%p1653_p12), %s327_s23, 1 }
  0x60   : > { %s328_s11 = scalar_lea.sflag (!%p1653_p12), [#allocation4], %s327_s23  ;;  %s331_s13 = scalar_lea.vmem (!%p1653_p12), [#allocation3], %s892_s15 }
  0x66   : > { %1308 = dma.done.wait (%p1654_p0), %s328_s11, 32  }
  0x67   : > { %1310 = vsyncadd (%p1654_p0), %s328_s11, 4294967264  ;;  %p1655_p6 = scmp.ne.s32.totalorder %s1648_s8, 0 }
  0x69   : > { %1312 = dma.done.wait (%p1655_p6), [#allocation7], 1280  }
  0x6a   : > { %1314 = vsyncadd (%p1655_p6), [#allocation7], 4294966016  ;;  %p390_p7 = scmp.eq.s32.totalorder %s1333_s27, 0 }
  0x6b   : > { %v1350_v0 = vmov (%p390_p7), 0.0  }
  0x6c   : > { %395 = sbr.rel (!%p390_p7) target bundleno = 115 (0x73), region = 60  ;;  %396 = vst [vmem:[#allocation2] sm:$0x3] (%p390_p7), %v1350_v0 }
  0x73 PF: > { %v397_v1 = vld [vmem:[%s331_s13] sm:$0x1]  ;;  %vm403_vm0 = vcmask 1040384   ;;  %v398_v2 = vld [vmem:[%s331_s13 + $0x1] sm:$0x1]  ;;  %v1351_v3 = vmov 0.0  }
  0x74   : > { %983 = vmatprep.subr.bf16.mxu0 %v1351_v3  ;;  %989 = vmatprep.subr.bf16.mxu1 %v1351_v3  ;;  %v405_v4 = vsel %vm403_vm0, %v397_v1, 0  ;;  %v448_v5 = vsel %vm403_vm0, %v398_v2, 0  ;;  %vm399_vm1 = vcmask 15360   ;;  %vm1352_vm2 = vmmov 0   ;;  %p499_p9 = scmp.eq.s32.totalorder %s1333_s27, 3 }
  0x75   : > { %984 = vmatpush3.bf16.msra.mxu0 %v405_v4  ;;  %990 = vmatpush3.bf16.msra.mxu1 %v448_v5  ;;  %v1353_v6 = vmov 1065369472   ;;  %vm494_vm3 = vcmask 1041409   ;;  %v490_v9 = vld [vmem:[#allocation2] sm:$0x3]  ;;  %v910_v19 = vld [vmem:[#allocation6] sm:$0xff] (%p499_p9)   ;;  %v701_v38 = vlaneseq (%p499_p9) }
  0x76   : > { %985 = vmatprep.mubr.msk.bf16.mxu0 %vm1352_vm2, %v1351_v3  ;;  %991 = vmatprep.mubr.msk.bf16.mxu1 %vm1352_vm2, %v1351_v3  ;;  %v1354_v20 = vmov (%p499_p9), 0.0|0.0   ;;  %v942_v21 = vld [vmem:[#allocation8] sm:$0xff] (%p499_p9)   ;;  %vm1355_vm4 = vmmov (%p499_p9), 0   ;;  %v1356_v22 = vmov (%p499_p9), 0.0   ;;  %v949_v23 = vld [vmem:[#allocation6 + $0x8] sm:$0xff] (%p499_p9)   ;;  %v950_v27 = vld [vmem:[#allocation6 + $0x10] sm:$0xff] (%p499_p9)  }
  0x77   : > { %1047 = vmatprep.subr.bf16.mxu1 (%p499_p9), %v1354_v20  ;;  %1041 = vmatprep.subr.bf16.mxu0 (%p499_p9), %v1354_v20  ;;  %v506_v24 = vld [vmem:[%s1637_s1] sm:$0x1] (%p499_p9)  ;;  %v956_v25 = vld [vmem:[#allocation8 + $0x8] sm:$0xff] (%p499_p9)   ;;  %vm548_vm5 = vcmask (%p499_p9), 261120   ;;  %v952_v29 = vld [vmem:[#allocation6 + $0x20] sm:$0xff] (%p499_p9)   ;;  %v1357_v35 = vmov (%p499_p9), 0  }
  0x78   : > { %986 = vmatmul.mubr.msk.bf16.vlgmr.msra.gmra.mrb[0].mxu0 %vm399_vm1, %v1353_v6  ;;  %992 = vmatmul.mubr.msk.bf16.vlgmr.msra.gmra.mrb[0].mxu1 %vm399_vm1, %v1353_v6  ;;  %v507_v26 = vunpack.c.l.bf16 (%p499_p9), %v506_v24  ;;  %v951_v28 = vld [vmem:[#allocation6 + $0x18] sm:$0xff] (%p499_p9)   ;;  %v953_v30 = vld [vmem:[#allocation6 + $0x28] sm:$0xff] (%p499_p9)   ;;  %v954_v31 = vld [vmem:[#allocation6 + $0x30] sm:$0xff] (%p499_p9)   ;;  %v702_v39 = vand.u32 (%p499_p9), 127, %v701_v38  ;;  %vm705_vm7 = vcmask (%p499_p9), 1041408   ;;  %vm728_vm9 = vcmask (%p499_p9), 1024  }
  0x79   : > { %1049 = vmatpush3.bf16.msra.mxu1 (%p499_p9), %v910_v19  ;;  %1003 = vmatprep.mubr.msk.f32.mxu0 (%p499_p9), %vm1355_vm4, %v1356_v22  ;;  %v955_v33 = vld [vmem:[#allocation6 + $0x38] sm:$0xff] (%p499_p9)  }
  0x7a   : > { %1050 = vmatprep.subr.bf16.mxu1 (%p499_p9), %v1354_v20  ;;  %1043 = vmatpush3.bf16.msra.mxu0 (%p499_p9), %v942_v21  ;;  %v900_v41 = vld [vmem:[%s1640_s4] ss:$0 sm:$0xff] (%p499_p9)  ;;  %vm703_vm6 = vcmp.lt.s32.totalorder (%p499_p9), %v702_v39, 2 }
  0x7b   : > { %1044 = vmatprep.subr.bf16.mxu0 (%p499_p9), %v1354_v20  ;;  %1038 = vmatprep.mubr.msk.f32.mxu1 (%p499_p9), %vm1355_vm4, %v1356_v22  ;;  %v718_v47 = vld [vmem:[%s1641_s5] sm:$0x3] (%p499_p9) }
  0x7c   : > { %1166 = vset.pattern.permute.xlu0 (%p499_p9), %v1357_v35 }
  0x7d   : > { %1052 = vmatpush3.bf16.msra.mxu1 (%p499_p9), %v949_v23 }
  0x7e   : > { %1053 = vmatprep.subr.bf16.mxu1 (%p499_p9), %v1354_v20  ;;  %1046 = vmatpush3.bf16.msra.mxu0 (%p499_p9), %v956_v25 }
  0x81   : > { %1055 = vmatpush3.bf16.msra.mxu1 (%p499_p9), %v950_v27 }
  0x82   : > { %1056 = vmatprep.subr.bf16.mxu1 (%p499_p9), %v1354_v20 }
  0x85   : > { %1058 = vmatpush3.bf16.msra.mxu1 (%p499_p9), %v951_v28 }
  0x86   : > { %1059 = vmatprep.subr.bf16.mxu1 (%p499_p9), %v1354_v20 }
  0x89   : > { %1061 = vmatpush3.bf16.msra.mxu1 (%p499_p9), %v952_v29 }
  0x8a   : > { %1062 = vmatprep.subr.bf16.mxu1 (%p499_p9), %v1354_v20 }
  0x8d   : > { %1064 = vmatpush3.bf16.msra.mxu1 (%p499_p9), %v953_v30 }
  0x8e   : > { %1065 = vmatprep.subr.bf16.mxu1 (%p499_p9), %v1354_v20 }
  0x91   : > { %1067 = vmatpush3.bf16.msra.mxu1 (%p499_p9), %v954_v31 }
  0x92   : > { %1068 = vmatprep.subr.bf16.mxu1 (%p499_p9), %v1354_v20 }
  0x95   : > { %1070 = vmatpush3.bf16.msra.mxu1 (%p499_p9), %v955_v33 }
 0x14b   : > { %v441_v7 = vpop.f32.mrb[0].mxu0  ;;  %v484_v8 = vpop.f32.mrb[0].mxu1  ;;  %503 = sbr.rel (!%p499_p9) target bundleno = 883 (0x373), region = 64 }
 0x14c   : > { %v493_v10 = vrot.slane %v484_v8, 7  ;;  %v987_v11 = vpop.f32.mrb[1].mxu0  ;;  %v993_v12 = vpop.f32.mrb[1].mxu1  ;;  %1004 = vmatmul.mubr.msk.f32.vlgmr.msra.gmra.mrb[0].mxu0 (%p499_p9), %vm548_vm5, %v507_v26 }
 0x14d   : > { %v444_v13 = vpop.f32.mrb[2].mxu0  ;;  %v487_v14 = vpop.f32.mrb[2].mxu1 }
 0x14e   : > { %v495_v15 = vsel %vm494_vm3, %v493_v10, %v441_v7  ;;  %v988_v16 = vpop.f32.mrb[3].mxu0  ;;  %v994_v17 = vpop.f32.mrb[3].mxu1 }
 0x14f   : > { %v497_v18 = vadd.f32 %v495_v15, %v490_v9 }
 0x151   : > { %498 = vst [vmem:[#allocation2] sm:$0x3] %v497_v18 }
 0x158   : > { %v504_v32 = vld [vmem:[#allocation2] sm:$0x3] }
 0x159   : > { %v505_v34 = vmul.f32 0.125, %v504_v32 }
 0x15b   : > { %1039 = vmatmul.mubr.f32.vlgmr.msra.gmra.mrb[0].mxu1 %v505_v34 }
 0x21f   : > { %v618_v36 = vpop.f32.mrb[0].mxu0 }
 0x220   : > { %v1005_v37 = vpop.f32.mrb[1].mxu0 }
 0x22e   : > { %v688_v40 = vpop.f32.mrb[0].mxu1 }
 0x22f   : > { %v689_v42 = vadd.f32 %v688_v40, %v618_v36  ;;  %v1040_v43 = vpop.f32.mrb[1].mxu1 }
 0x231   : > { %v699_v44 = vadd.f32 %v900_v41, %v689_v42 }
 0x233   : > { %700 = vst [vmem:[#allocation9] sm:$0x3] %v699_v44  ;;  %v704_v45 = vsel %vm703_vm6, %v699_v44, -1e+30 }
 0x234   : > { %v706_v46 = vsel %vm705_vm7, %v704_v45, -inf }
 0x235   : > { %707 = vmax.xlane.f32.xlu0 %v706_v46 }
 0x24b   : > { %720 = vperm.xlu0 %1166, %v718_v47  }
 0x2c2   : > { %v708_v48 = vpop.xlane.xlu0 %707 }
 0x2c3   : > { %v709_v49 = vsub.f32 %v704_v45, %v708_v48 }
 0x2c5   : > { %v710_v50 = vmul.f32 1.442695, %v709_v49 }
 0x2c7   : > { %1167 = vpow2.f32 %v710_v50 }
 0x2ca   : > { %v721_v51 = vpop.permute.xlu0 %720 }
 0x2cb   : > { %vm722_vm8 = vcmp.eq.s32.totalorder %v702_v39, %v721_v51 }
 0x2cc   : > { %v723_v54 = vsel %vm722_vm8, %v699_v44, 0.0 }
 0x2cd   : > { %v724_v55 = vsel %vm705_vm7, %v723_v54, 0.0 }
 0x2d1   : > { %v1168_v52 = vpop.eup %1167 }
 0x2d2   : > { %v712_v53 = vsel %vm705_vm7, %v1168_v52, 0.0 }
 0x2d3   : > { %713 = vadd.xlane.f32.xlu1 %v712_v53 }
 0x2d7   : > { %725 = vadd.xlane.f32.xlu1 %v724_v55 }
 0x360   : > { %v714_v56 = vpop.xlane.xlu1 %713 }
 0x361   : > { %1169 = vlog2.f32 %v714_v56 }
 0x364   : > { %v726_v60 = vpop.xlane.xlu1 %725 }
 0x36b   : > { %v1170_v57 = vpop.eup %1169 }
 0x36c   : > { %v716_v58 = vmul.f32 0.6931472, %v1170_v57 }
 0x36e   : > { %v717_v59 = vadd.f32 %v716_v58, %v708_v48 }
 0x370   : > { %v727_v61 = vsub.f32 %v717_v59, %v726_v60 }
 0x372   : > { %729 = vst.msk [vmem:[%s1643_s7] sm:$0x3] %vm728_vm9, %v727_v61 }
 0x373 PF: > { %p1592_p8 = scmp.eq.s32.totalorder %s881_s30, 3  ;;  %s1358_s20 = smov [#allocation9]  }
 0x374   : > { %s743_s18 = sshll.u32 %s1358_s20, 4  ;;  %s744_s18 = int_to_ptr.vmem [resolvable:$true] %s743_s18 }
 0x375   : > { %s1257_s21 = scalar_lea.vmem %s744_s18, 32  ;;  %p1264_p10 = scmp.lt.s32.totalorder %s744_s18, %s744_s18 }
 0x376   : > { %p1258_p1 = scmp.ne.s32.totalorder %s744_s18, %s1257_s21  ;;  %p1265_p11 = scmp.lt.s32.totalorder %s1257_s21, %s1257_s21 }
 0x378   : > { %p1259_p4 = pnand %p1258_p1, %p1592_p8  ;;  %p1266_p13 = por %p1265_p11, %p1264_p10 }
 0x37a   : > { %p1260_p5 = pneg %p1259_p4 }
 0x37c   : > { %p1267_p2 = pnand %p1266_p13, %p1260_p5 }
 0x37e   : > { %1270 = shalt.err (!%p1267_p2)
}
 0x37f   : > { %s1271_s30 = scalar_lea.hbm %s1642_s6, 32 }
 0x380   : > { %p1272_p3 = scmp.ne.s32.totalorder %s1642_s6, %s1271_s30  ;;  %p1277_p6 = scmp.lt.u32.totalorder %s1271_s30, %s1642_s6 }
 0x382   : > { %p1273_p12 = pnand %p1272_p3, %p1592_p8 }
 0x384   : > { %p1274_p0 = pneg %p1273_p12 }
 0x386   : > { %p1279_p7 = pnand %p1277_p6, %p1274_p0 }
 0x388   : > { %1282 = shalt.err (!%p1279_p7)
}
 0x389   : > { %1082 = dma.vmem_to_hbm [thread:$0]  (%p1592_p8), %s744_s18, 32, %s1642_s6, [#allocation5]  }
 0x38a   : > { %1316 = dma.done.wait (%p1592_p8), [#allocation5], 32  }
 0x38b   : > { %1318 = vsyncadd (%p1592_p8), [#allocation5], 4294967264 }
 0x38c PF: > { %s23_s29 = sadd.s32 1, %s1341_s29   ;;  %s1657_s24 = smov %s1325_s25 }
 0x38d   : > { %p20_p9 = scmp.ge.s32.totalorder %s23_s29, 6   ;;  %s1658_s25 = smov %s1329_s26 }
 0x38e   : > { %s1659_s26 = smov %s1517_s22  ;;  %s1660_s27 = smov %s1337_s28 }
 0x38f   : > { %s1661_s28 = smov %s1663_s17  ;;  %22 = sbr.rel (!%p20_p9) target bundleno = 6 (0x6), region = 116 }
 0x396   :  { %766 = vsyncpa [#allocation4], 1 }
 0x397   :  { %768 = vsyncpa [#allocation4 + $0x1], 1 }
 0x398   :  { %769 = vsyncpa [#allocation7], 1 }
 0x399   :  { %770 = vsyncpa [#allocation5], 1 }
 0x39a   :  { %772 = vsyncpa [#allocation5 + $0x1], 1 }

</bundles_post_ra>
